<compile_context>
chip_gen: v7x
topology: tpu7x:2x2x1
jax: 0.10.0
libtpu: 0.0.40
codegen_flags: <defaults>
</compile_context>

<pallas_src>
import jax
import jax.numpy as jnp
from jax.experimental import pallas as pl
from jax.experimental.pallas import tpu as pltpu

_LANES = 128  # vreg lane width; batch tiles are multiples of this


def dqn_kernel(x_ref, p_ref, w2t_ref, o_ref):
    """x_ref:   (n_in, bb) f32   -- x.T tile, batch on lanes
       p_ref:   (H, n_in+4) f32  -- columns [w1.T | b1 | b2 | w3 | b3]
       w2t_ref: (H, H) bf16      -- w2.T
       o_ref:   (1, bb) f32      -- lane-dense Q-value row."""
    n_in = x_ref.shape[0]
    x = x_ref[...]                            # (n_in, bb) f32
    p = p_ref[...]                            # (H, n_in + 4) f32

    w1t = p[:, 0:n_in]                        # (H, n_in)  == w1.T
    b1 = p[:, n_in:n_in + 1]                  # (H, 1)
    b2 = p[:, n_in + 1:n_in + 2]              # (H, 1)
    w3 = p[:, n_in + 2:n_in + 3]              # (H, 1)
    b3 = p[0:1, n_in + 3:n_in + 4]            # (1, 1)

    # Layer 1 on the VPU: K = n_in (= 2) is far too small for the MXU.
    # (H,1) columns broadcast over lanes, (1,bb) rows broadcast over sublanes.
    h1 = b1
    for k in range(n_in):                     # static unroll over n_in
        h1 = h1 + w1t[:, k:k + 1] * x[k:k + 1, :]
    h1 = jnp.maximum(h1, 0.0)                 # (H, bb) f32

    # Layer 2 on the MXU: h2.T = relu(w2.T @ h1.T + b2); bf16 operands, f32 acc.
    h2 = jnp.dot(w2t_ref[...], h1.astype(jnp.bfloat16),
                 preferred_element_type=jnp.float32) + b2
    h2 = jnp.maximum(h2, 0.0)                 # (H, bb) f32

    # Layer 3 (N = 1): VPU multiply + XLU sublane reduce -> lane-dense (1, bb).
    q = jnp.sum(h2 * w3, axis=0, keepdims=True) + b3
    o_ref[...] = q.astype(o_ref.dtype)        # unmasked full-lane row store


def _round_up(a, m):
    return (a + m - 1) // m * m


def _choose_tiling(B, block_b):
    """Batch maps to lanes, so tiles are multiples of 128 (or the full padded
    batch).  Keep >= 2 grid steps when the batch allows so v7x's two
    TensorCores can split the parallel batch axis."""
    Bp = _round_up(max(B, 1), _LANES)
    bb = min(_round_up(block_b, _LANES), Bp)
    if Bp // bb < 2 and Bp >= 2 * _LANES:
        bb = _round_up(Bp // 2, _LANES)
    Bp = _round_up(Bp, bb)
    return bb, Bp


def dqn_forward(x, packed, *, block_b=1024):
    """x: (B, n_in) f32. packed: dict with 'small' (H, n_in+4) f32 and
    'w2t_bf16' (H, H) bf16 (see pack_dqn_params). Returns (B, 1) f32."""
    B, n_in = x.shape
    small = packed["small"]
    w2t = packed["w2t_bf16"]
    H = w2t.shape[0]
    assert small.shape == (H, n_in + 4), small.shape

    bb, Bp = _choose_tiling(B, block_b)

    # Batch-on-lanes layout. Zero-padded batch columns produce garbage Q-values
    # that are sliced off below (no in-kernel batch reduction, so no masking).
    xt = x.T.astype(jnp.float32)
    if Bp != B:
        xt = jnp.pad(xt, ((0, 0), (0, Bp - B)))

    flops = 2 * Bp * H * (H + n_in + 1)                       # all three layers
    bytes_accessed = xt.size * 4 + small.size * 4 + w2t.size * 2 + Bp * 4

    out = pl.pallas_call(
        dqn_kernel,
        out_shape=jax.ShapeDtypeStruct((1, Bp), jnp.float32),
        grid_spec=pltpu.PrefetchScalarGridSpec(
            num_scalar_prefetch=0,
            grid=(Bp // bb,),
            in_specs=[
                # activations: streamed per batch tile (auto double-buffered)
                pl.BlockSpec((n_in, bb), lambda i: (0, i)),
                # packed small params: block (0,0) every step -> DMA'd once,
                # VMEM-resident across the whole call
                pl.BlockSpec((H, n_in + 4), lambda i: (0, 0)),
                # bf16 w2.T: block (0,0) every step -> VMEM-resident
                pl.BlockSpec((H, H), lambda i: (0, 0)),
            ],
            # lane-dense row store instead of a (bb, 1) masked column
            out_specs=pl.BlockSpec((1, bb), lambda i: (0, i)),
        ),
        compiler_params=pltpu.CompilerParams(
            # batch tiles are independent: lets v7x shard them across its 2 TCs
            dimension_semantics=("parallel",),
        ),
        cost_estimate=pl.CostEstimate(
            flops=flops, transcendentals=0, bytes_accessed=bytes_accessed),
    )(xt, small, w2t)
    return out[0, :B][:, None]


def init_dqn_params(key, n_in_features=2, n_out_features=1, hidden=128):
    """Deterministic init mimicking nn.Linear's uniform(-1/sqrt(fan_in), ...).
    Weights stored (in, out); biases stored (out,)."""
    ks = jax.random.split(key, 6)

    def linear(kw, kb, fan_in, fan_out):
        bound = 1.0 / (fan_in ** 0.5)
        w = jax.random.uniform(kw, (fan_in, fan_out), jnp.float32, -bound, bound)
        b = jax.random.uniform(kb, (fan_out,), jnp.float32, -bound, bound)
        return w, b

    w1, b1 = linear(ks[0], ks[1], n_in_features, hidden)
    w2, b2 = linear(ks[2], ks[3], hidden, hidden)
    w3, b3 = linear(ks[4], ks[5], hidden, n_out_features)
    return {"w1": w1, "b1": b1, "w2": w2, "b2": b2, "w3": w3, "b3": b3}


def pack_dqn_params(p):
    """Fold the 6 parameter tensors into 2 kernel slabs (done once, off the hot
    path).  Column layout matches the transposed (batch-on-lanes) kernel.
    Requires n_out == 1 (the module default)."""
    n_in, H = p["w1"].shape
    assert p["w3"].shape == (H, 1), "packing assumes n_out_features == 1"
    small = jnp.concatenate(
        [
            p["w1"].T,                                   # (H, n_in)
            p["b1"][:, None],                            # (H, 1)
            p["b2"][:, None],                            # (H, 1)
            p["w3"][:, 0:1],                             # (H, 1)
            jnp.full((H, 1), p["b3"][0], jnp.float32),   # (H, 1) scalar b3
        ],
        axis=1,
    ).astype(jnp.float32)                                # (H, n_in + 4)
    return {"small": small, "w2t_bf16": p["w2"].T.astype(jnp.bfloat16)}


def dqn_reference_f32(x, p):
    """Torch-faithful pure-f32 forward (loose sanity bound only)."""
    hi = jax.lax.Precision.HIGHEST
    h1 = jnp.maximum(jnp.dot(x, p["w1"], precision=hi) + p["b1"], 0.0)
    h2 = jnp.maximum(jnp.dot(h1, p["w2"], precision=hi) + p["b2"], 0.0)
    return jnp.dot(h2, p["w3"], precision=hi) + p["b3"]


def dqn_reference_matched(x, p):
    """Reference matching the kernel's numerics: bf16 MXU operands for layer 2,
    true f32 everywhere else."""
    hi = jax.lax.Precision.HIGHEST
    h1 = jnp.maximum(jnp.dot(x, p["w1"], precision=hi) + p["b1"], 0.0)
    h2 = jnp.dot(h1.astype(jnp.bfloat16), p["w2"].astype(jnp.bfloat16),
                 preferred_element_type=jnp.float32) + p["b2"]
    h2 = jnp.maximum(h2, 0.0)
    return jnp.dot(h2, p["w3"], precision=hi) + p["b3"]


if __name__ == "__main__":
    key = jax.random.PRNGKey(0)
    k_param, k_x = jax.random.split(key)

    n_in, n_out = 2, 1
    batch = 256  # replay-buffer-sized batch amortizes launch + weight DMA cost

    params = init_dqn_params(k_param, n_in, n_out)
    packed = pack_dqn_params(params)

    # inputs: (current score, number of dice remaining) per sample
    x = jax.random.uniform(k_x, (batch, n_in), jnp.float32, 0.0, 10.0)

    out = jax.block_until_ready(dqn_forward(x, packed))
    assert out.shape == (batch, n_out), out.shape

    # Tight check against a reference with identical bf16-layer-2 numerics.
    ref_matched = dqn_reference_matched(x, params)
    assert jnp.allclose(out, ref_matched, atol=2e-3, rtol=2e-3), (
        jnp.max(jnp.abs(out - ref_matched)))

    # Loose structural check against pure-f32 torch semantics (bounds the bf16
    # weight quantization drift; catches layout/transpose bugs).
    ref_f32 = dqn_reference_f32(x, params)
    assert jnp.max(jnp.abs(out - ref_f32)) < 1.0, jnp.max(jnp.abs(out - ref_f32))

    # Ragged / padded batch path (B not a multiple of the 128-lane tile).
    out_small = jax.block_until_ready(dqn_forward(x[:5], packed))
    assert out_small.shape == (5, n_out), out_small.shape
    assert jnp.allclose(out_small, ref_matched[:5], atol=2e-3, rtol=2e-3)

    print("KERNEL_OK")
</pallas_src>

<mosaic_0001>
module attributes {stable_mosaic.version = 11 : i64} {
  func.func @dqn_kernel(%arg0: i32, %arg1: memref<2x128xf32, #tpu.memory_space<vmem>>, %arg2: memref<128x6xf32, #tpu.memory_space<vmem>>, %arg3: memref<128x128xbf16, #tpu.memory_space<vmem>>, %arg4: memref<1x128xf32, #tpu.memory_space<vmem>>) attributes {dimension_semantics = [#tpu.dimension_semantics<parallel>], iteration_bounds = array<i64: 2>, scalar_prefetch = 0 : i64, scratch_operands = 0 : i64, tpu.core_type = #tpu.core_type<tc>, window_params = [{transform_indices = @transform_0, window_bounds = array<i64: 2, 128>}, {pipeline_mode = #tpu.pipeline_mode<synchronous>, transform_indices = @transform_1, window_bounds = array<i64: 128, 6>}, {pipeline_mode = #tpu.pipeline_mode<synchronous>, transform_indices = @transform_2, window_bounds = array<i64: 128, 128>}, {transform_indices = @transform_3, window_bounds = array<i64: 1, 128>}]} {
    %c0 = arith.constant 0 : index
    %c0_0 = arith.constant 0 : index
    %0 = vector.load %arg1[%c0, %c0_0] : memref<2x128xf32, #tpu.memory_space<vmem>>, vector<2x128xf32>
    %c0_1 = arith.constant 0 : index
    %c0_2 = arith.constant 0 : index
    %1 = vector.load %arg2[%c0_1, %c0_2] : memref<128x6xf32, #tpu.memory_space<vmem>>, vector<128x6xf32>
    %2 = vector.extract_strided_slice %1 {offsets = [0, 0], sizes = [128, 2], strides = [1, 1]} : vector<128x6xf32> to vector<128x2xf32>
    %3 = vector.extract_strided_slice %1 {offsets = [0, 2], sizes = [128, 1], strides = [1, 1]} : vector<128x6xf32> to vector<128x1xf32>
    %4 = vector.extract_strided_slice %1 {offsets = [0, 3], sizes = [128, 1], strides = [1, 1]} : vector<128x6xf32> to vector<128x1xf32>
    %5 = vector.extract_strided_slice %1 {offsets = [0, 4], sizes = [128, 1], strides = [1, 1]} : vector<128x6xf32> to vector<128x1xf32>
    %6 = vector.extract_strided_slice %1 {offsets = [0, 5], sizes = [1, 1], strides = [1, 1]} : vector<128x6xf32> to vector<1x1xf32>
    %7 = vector.extract_strided_slice %2 {offsets = [0, 0], sizes = [128, 1], strides = [1, 1]} : vector<128x2xf32> to vector<128x1xf32>
    %8 = vector.extract_strided_slice %0 {offsets = [0, 0], sizes = [1, 128], strides = [1, 1]} : vector<2x128xf32> to vector<1x128xf32>
    %9 = vector.broadcast %7 : vector<128x1xf32> to vector<128x128xf32>
    %10 = vector.broadcast %8 : vector<1x128xf32> to vector<128x128xf32>
    %11 = arith.mulf %9, %10 : vector<128x128xf32>
    %12 = vector.broadcast %3 : vector<128x1xf32> to vector<128x128xf32>
    %13 = arith.addf %12, %11 : vector<128x128xf32>
    %14 = vector.extract_strided_slice %2 {offsets = [0, 1], sizes = [128, 1], strides = [1, 1]} : vector<128x2xf32> to vector<128x1xf32>
    %15 = vector.extract_strided_slice %0 {offsets = [1, 0], sizes = [1, 128], strides = [1, 1]} : vector<2x128xf32> to vector<1x128xf32>
    %16 = vector.broadcast %14 : vector<128x1xf32> to vector<128x128xf32>
    %17 = vector.broadcast %15 : vector<1x128xf32> to vector<128x128xf32>
    %18 = arith.mulf %16, %17 : vector<128x128xf32>
    %19 = arith.addf %13, %18 : vector<128x128xf32>
    %cst = arith.constant 0.000000e+00 : f32
    %20 = vector.broadcast %cst : f32 to vector<128x128xf32>
    %21 = arith.maximumf %19, %20 : vector<128x128xf32>
    %c0_3 = arith.constant 0 : index
    %c0_4 = arith.constant 0 : index
    %22 = vector.load %arg3[%c0_3, %c0_4] : memref<128x128xbf16, #tpu.memory_space<vmem>>, vector<128x128xbf16>
    %23 = arith.truncf %21 : vector<128x128xf32> to vector<128x128xbf16>
    %cst_5 = arith.constant dense<0.000000e+00> : vector<128x128xf32>
    %24 = tpu.matmul %22, %23, %cst_5 {dimension_numbers = #tpu.dot_dimension_numbers<[1], [0], [0], [1], [0, 0, 1, 1], [], []>} : vector<128x128xbf16>, vector<128x128xbf16>, vector<128x128xf32> -> vector<128x128xf32>
    %25 = vector.broadcast %4 : vector<128x1xf32> to vector<128x128xf32>
    %26 = arith.addf %24, %25 : vector<128x128xf32>
    %cst_6 = arith.constant 0.000000e+00 : f32
    %27 = vector.broadcast %cst_6 : f32 to vector<128x128xf32>
    %28 = arith.maximumf %26, %27 : vector<128x128xf32>
    %29 = vector.broadcast %5 : vector<128x1xf32> to vector<128x128xf32>
    %30 = arith.mulf %28, %29 : vector<128x128xf32>
    %cst_7 = arith.constant dense<0.000000e+00> : vector<128xf32>
    %31 = vector.multi_reduction <add>, %30, %cst_7 [0] : vector<128x128xf32> to vector<128xf32>
    %32 = vector.shape_cast %31 : vector<128xf32> to vector<1x128xf32>
    %33 = vector.broadcast %6 : vector<1x1xf32> to vector<1x128xf32>
    %34 = arith.addf %32, %33 : vector<1x128xf32>
    %c0_8 = arith.constant 0 : index
    %c0_9 = arith.constant 0 : index
    %35 = vector.load %arg4[%c0_8, %c0_9] : memref<1x128xf32, #tpu.memory_space<vmem>>, vector<1x128xf32>
    tpu.vector_store %arg4[%c0_8, %c0_9], %34 {strides = array<i32>} : memref<1x128xf32, #tpu.memory_space<vmem>>, vector<1x128xf32>,
    return
  }
  func.func @transform_0(%arg0: i32) -> (i32, i32) {
    %c0_i32 = arith.constant 0 : i32
    %c0_i32_0 = arith.constant 0 : i32
    return %c0_i32, %arg0 : i32, i32
  }
  func.func @transform_1(%arg0: i32) -> (i32, i32) {
    %c0_i32 = arith.constant 0 : i32
    %c0_i32_0 = arith.constant 0 : i32
    %c0_i32_1 = arith.constant 0 : i32
    return %c0_i32, %c0_i32_0 : i32, i32
  }
  func.func @transform_2(%arg0: i32) -> (i32, i32) {
    %c0_i32 = arith.constant 0 : i32
    %c0_i32_0 = arith.constant 0 : i32
    %c0_i32_1 = arith.constant 0 : i32
    return %c0_i32, %c0_i32_0 : i32, i32
  }
  func.func @transform_3(%arg0: i32) -> (i32, i32) {
    %c0_i32 = arith.constant 0 : i32
    %c0_i32_0 = arith.constant 0 : i32
    return %c0_i32, %arg0 : i32, i32
  }
}

</mosaic_0001>

<bundles_post_ra>
// kernel: tpu_custom_call.1
= control target key start
LH: loop header
LB: loop body
LE: loop exit
PB: predicated region body
PF: predicated region fallthrough
CT: control target
= control target key end

     0   :  { %8 = vsyncpa [#allocation3], 0  ;;  %s1530_s0 = inlined_call_operand.vmem [shape: f32[2,256], index: 0, kind: input, shape index: {}]   ;;  %s1531_s1 = inlined_call_operand.vmem [shape: f32[128,6], index: 1, kind: input, shape index: {}]   ;;  %s1532_s2 = inlined_call_operand.vmem [shape: bf16[128,128], index: 2, kind: input, shape index: {}]   ;;  %s1533_s3 = inlined_call_operand.hbm [shape: f32[1,256], index: 3, kind: output, shape index: {}]  }
   0x1   :  { %10 = vsyncpa [#allocation3 + $0x1], 0  ;;  %s1160_s12 = smov 0   ;;  %s1162_s13 = smov 0  }
   0x2   :  { %s1164_s14 = smov 0   ;;  %s1166_s15 = smov 0  }
   0x3 LB: > { %s1181_s16 = sadd.s32 4294967295, %s1131_s15   ;;  %s903_s17 = sadd.s32 4294967294, %s1131_s15   ;;  %s1131_s15 = sphi %s1166_s15, %s1539_s15   ;;  %s1127_s14 = sphi %s1164_s14, %s1538_s14   ;;  %s1123_s13 = sphi %s1162_s13, %s1537_s13   ;;  %s1119_s12 = sphi %s1160_s12, %s1536_s12  }
   0x4   : > { %s1185_s18 = sadd.s32 1, %s1131_s15   ;;  %s91_s19 = sadd.s32 1, %s1127_s14 }
   0x5   : > { %s88_s20 = ssub.s32 %s1131_s15, %s1185_s18  ;;  %p101_p0 = scmp.ne.s32.totalorder %s1127_s14, %s1123_s13 }
   0x6   : > { %p89_p1 = scmp.eq.s32.totalorder %s88_s20, 0  ;;  %p102_p2 = scmp.eq.s32.totalorder %s1181_s16, 1 }
   0x7   : > { %p107_p3 = scmp.ne.s32.totalorder %s1123_s13, %s1119_s12  ;;  %p108_p4 = scmp.eq.s32.totalorder %s903_s17, 1 }
   0x8   : > { %s1196_s21 = scalar_select %p89_p1, %s1127_s14, %s91_s19  }
   0x9   : > { %p1198_p5 = por %p102_p2, %p101_p0  ;;  %p1202_p6 = por %p108_p4, %p107_p3 }
   0xa   : > { %p906_p7 = scmp.ge.s32.totalorder %s1131_s15, 1  ;;  %p139_p8 = scmp.lt.s32.totalorder %s1131_s15, 3 }
   0xc   : > { %p140_p9 = pnand %p906_p7, %p139_p8 }
   0xd   : > { %v1211_v0 = vld [vmem:[%s1531_s1] sm:$0xff] (!%p140_p9)  ;;  %v1133_v1 = vmov (!%p140_p9), 2   ;;  %v1134_v2 = vmov (!%p140_p9), 0   ;;  %v1220_v3 = vld [vmem:[%s1531_s1 + $0x8] sm:$0xff] (!%p140_p9)  ;;  %v1227_v4 = vld [vmem:[%s1531_s1 + $0x18] sm:$0xff] (!%p140_p9)  ;;  %v1135_v5 = vmov (!%p140_p9), 1   ;;  %v263_v28 = vlaneseq (!%p140_p9) }
   0xe   : > { %143 = sbr.rel (%p140_p9) target bundleno = 576 (0x240), region = 32  ;;  %1029 = vset.pattern.permute.xlu1 (!%p140_p9), %v1133_v1  ;;  %1028 = vset.pattern.permute.xlu0 (!%p140_p9), %v1134_v2  ;;  %v1235_v6 = vld [vmem:[%s1531_s1 + $0x28] sm:$0xff] (!%p140_p9)  ;;  %v1240_v7 = vld [vmem:[%s1531_s1 + $0x10] sm:$0xff] (!%p140_p9)  ;;  %v1247_v8 = vld [vmem:[%s1531_s1 + $0x38] sm:$0xff] (!%p140_p9)  ;;  %p161_p10 = scmp.lt.s32.totalorder (!%p140_p9), %s1181_s16, 1  ;;  %v1136_v50 = vmov (!%p140_p9), 3  }
   0xf   : > { %284 = vperm.xlu1 (!%p140_p9), %1029, %v1211_v0   ;;  %185 = vperm.xlu0 (!%p140_p9), %1028, %v1211_v0   ;;  %v1254_v9 = vld [vmem:[%s1531_s1 + $0x48] sm:$0xff] (!%p140_p9)  ;;  %v1262_v10 = vld [vmem:[%s1531_s1 + $0x58] sm:$0xff] (!%p140_p9)  ;;  %v1282_v13 = vld [vmem:[%s1531_s1 + $0x20] sm:$0xff] (!%p140_p9)  ;;  %v264_v31 = vshrl.u32 (!%p140_p9), %v263_v28, 7  ;;  %s159_s20 = sand.u32 (!%p140_p9), 1, %s1123_s13  }
  0x10   : > { %v1269_v11 = vld [vmem:[%s1531_s1 + $0x68] sm:$0xff] (!%p140_p9)  ;;  %v1277_v12 = vld [vmem:[%s1531_s1 + $0x78] sm:$0xff] (!%p140_p9)  ;;  %v1299_v14 = vld [vmem:[%s1531_s1 + $0x30] sm:$0xff] (!%p140_p9)  ;;  %s160_s25 = scalar_lea.vmem (!%p140_p9), [#allocation2], %s159_s20  ;;  %s836_s30 = scalar_lea.sflag (!%p140_p9), [#allocation3], %s159_s20 }
  0x11   : > { %v1307_v15 = vld [vmem:[%s1531_s1 + $0x40] sm:$0xff] (!%p140_p9)  ;;  %v1314_v16 = vld [vmem:[%s1531_s1 + $0x50] sm:$0xff] (!%p140_p9)  ;;  %v265_v36 = vsub.s32 (!%p140_p9), 0, %v264_v31  ;;  %v429_v37 = vsub.s32 (!%p140_p9), 1, %v264_v31  ;;  %s848_s26 = sshll.u32 (!%p140_p9), %s160_s25, 4  ;;  %s1490_s26 = int_to_ptr.vmem [resolvable:$true] %s848_s26 }
  0x12   : > { %v1321_v17 = vld [vmem:[%s1531_s1 + $0x60] sm:$0xff] (!%p140_p9)  ;;  %v1328_v18 = vld [vmem:[%s1531_s1 + $0x70] sm:$0xff] (!%p140_p9)  ;;  %s1069_s4 = scalar_lea.vmem (!%p140_p9), %s1490_s26, 16 }
  0x13   : > { %288 = vperm.xlu1 (!%p140_p9), %1029, %v1220_v3   ;;  %190 = vperm.xlu0 (!%p140_p9), %1028, %v1220_v3   ;;  %v1061_v34 = vld [vmem:[%s1532_s2] sm:$0xff] (!%p140_p9)   ;;  %p1070_p11 = scmp.ne.s32.totalorder (!%p140_p9), %s1490_s26, %s1069_s4 }
  0x14   : > { %v1062_v35 = vld [vmem:[%s1532_s2 + $0x20] sm:$0xff] (!%p140_p9)   ;;  %951 = vmatprep.mubr.bf16.mxu0 (!%p140_p9), %v1061_v34 }
  0x15   : > { %s162_s11 = scalar_select %p161_p10, %s1181_s16, 1  ;;  %959 = vmatprep.mubr.bf16.mxu1 %v1062_v35 }
  0x16   : > { %p1071_p12 = pnand %p1070_p11, %p1198_p5 }
  0x17   : > { %1030 = vset.pattern.permute.xlu1 %v1135_v5  ;;  %200 = vperm.xlu0 %1028, %v1227_v4   ;;  %s907_s17 = sshll.u32 %s162_s11, 1 }
  0x18   : > { %368 = vperm.xlu1 %1030, %v1220_v3   ;;  %s164_s24 = scalar_lea.vmem %s1530_s0, %s907_s17  ;;  %p1072_p13 = pneg %p1071_p12 }
  0x19   : > { %v166_v38 = vld [vmem:[%s164_s24] sm:$0x3]  ;;  %s916_s24 = sshll.u32 %s1181_s16, 4  ;;  %s1139_s16 = smov [#allocation2]  }
  0x1a   : > { %v1380_v41 = vrot.slane %v166_v38, %v265_v36  ;;  %v1382_v42 = vrot.slane %v166_v38, %v429_v37  ;;  %s1488_s29 = scalar_lea.hbm %s1533_s3, %s916_s24  ;;  %s1073_s5 = sshll.u32 %s1139_s16, 4  ;;  %s1074_s5 = int_to_ptr.vmem [resolvable:$false] %s1073_s5 }
  0x1b   : > { %210 = vperm.xlu0 %1028, %v1235_v6   ;;  %s1075_s6 = scalar_lea.vmem %s1074_s5, 32  ;;  %p1076_p0 = scmp.lt.s32.totalorder %s1490_s26, %s1074_s5 }
  0x1c   : > { %1031 = vset.pattern.permute.xlu1 %v1134_v2  ;;  %p1077_p1 = scmp.lt.s32.totalorder %s1075_s6, %s1069_s4 }
  0x1d   : > { %195 = vperm.xlu1 %1031, %v1240_v7  }
  0x1e   : > { %p1078_p2 = por %p1077_p1, %p1076_p0 }
  0x1f   : > { %220 = vperm.xlu0 %1028, %v1247_v8  }
  0x20   : > { %p1079_p3 = pnand %p1078_p2, %p1072_p13 }
  0x21   : > { %1032 = vset.pattern.permute.xlu1 %v1133_v1 }
  0x22   : > { %292 = vperm.xlu1 %1032, %v1240_v7  }
  0x23   : > { %230 = vperm.xlu0 %1028, %v1254_v9  }
  0x26   : > { %296 = vperm.xlu1 %1032, %v1227_v4  }
  0x27   : > { %240 = vperm.xlu0 %1028, %v1262_v10  }
  0x2a   : > { %1033 = vset.pattern.permute.xlu1 %v1135_v5 }
  0x2b   : > { %376 = vperm.xlu1 %1033, %v1227_v4   ;;  %250 = vperm.xlu0 %1028, %v1269_v11  }
  0x2f   : > { %1034 = vset.pattern.permute.xlu1 %v1134_v2  ;;  %260 = vperm.xlu0 %1028, %v1277_v12  }
  0x30   : > { %205 = vperm.xlu1 %1034, %v1282_v13  }
  0x33   : > { %1050 = vset.pattern.permute.xlu0 %v1135_v5 }
  0x34   : > { %1035 = vset.pattern.permute.xlu1 %v1133_v1  ;;  %364 = vperm.xlu0 %1050, %v1211_v0  }
  0x35   : > { %300 = vperm.xlu1 %1035, %v1282_v13  }
  0x38   : > { %372 = vperm.xlu0 %1050, %v1240_v7  }
  0x39   : > { %304 = vperm.xlu1 %1035, %v1235_v6  }
  0x3c   : > { %380 = vperm.xlu0 %1050, %v1282_v13  }
  0x3d   : > { %1036 = vset.pattern.permute.xlu1 %v1135_v5 }
  0x3e   : > { %384 = vperm.xlu1 %1036, %v1235_v6  }
  0x40   : > { %388 = vperm.xlu0 %1050, %v1299_v14  }
  0x42   : > { %1037 = vset.pattern.permute.xlu1 %v1134_v2 }
  0x43   : > { %215 = vperm.xlu1 %1037, %v1299_v14  }
  0x44   : > { %396 = vperm.xlu0 %1050, %v1307_v15  }
  0x47   : > { %1038 = vset.pattern.permute.xlu1 %v1133_v1 }
  0x48   : > { %308 = vperm.xlu1 %1038, %v1299_v14   ;;  %404 = vperm.xlu0 %1050, %v1314_v16  }
  0x4c   : > { %312 = vperm.xlu1 %1038, %v1247_v8   ;;  %412 = vperm.xlu0 %1050, %v1321_v17  }
  0x50   : > { %1039 = vset.pattern.permute.xlu1 %v1135_v5  ;;  %420 = vperm.xlu0 %1050, %v1328_v18  }
  0x51   : > { %392 = vperm.xlu1 %1039, %v1247_v8  }
  0x54   : > { %1054 = vset.pattern.permute.xlu0 %v1136_v50 }
  0x55   : > { %1040 = vset.pattern.permute.xlu1 %v1134_v2  ;;  %508 = vperm.xlu0 %1054, %v1220_v3  }
  0x56   : > { %225 = vperm.xlu1 %1040, %v1307_v15  }
  0x59   : > { %520 = vperm.xlu0 %1054, %v1282_v13  }
  0x5a   : > { %1041 = vset.pattern.permute.xlu1 %v1133_v1 }
  0x5b   : > { %316 = vperm.xlu1 %1041, %v1307_v15  }
  0x5f   : > { %320 = vperm.xlu1 %1041, %v1254_v9  }
  0x63   : > { %1042 = vset.pattern.permute.xlu1 %v1135_v5 }
  0x64   : > { %400 = vperm.xlu1 %1042, %v1254_v9  }
  0x68   : > { %1043 = vset.pattern.permute.xlu1 %v1134_v2 }
  0x69   : > { %235 = vperm.xlu1 %1043, %v1314_v16  }
  0x6d   : > { %1044 = vset.pattern.permute.xlu1 %v1133_v1 }
  0x6e   : > { %324 = vperm.xlu1 %1044, %v1314_v16  }
  0x72   : > { %328 = vperm.xlu1 %1044, %v1262_v10  }
  0x76   : > { %1045 = vset.pattern.permute.xlu1 %v1135_v5 }
  0x77   : > { %408 = vperm.xlu1 %1045, %v1262_v10  }
  0x7b   : > { %1046 = vset.pattern.permute.xlu1 %v1134_v2 }
  0x7c   : > { %245 = vperm.xlu1 %1046, %v1321_v17  }
  0x80   : > { %1047 = vset.pattern.permute.xlu1 %v1133_v1 }
  0x81   : > { %332 = vperm.xlu1 %1047, %v1321_v17  }
  0x85   : > { %336 = vperm.xlu1 %1047, %v1269_v11  }
  0x89   : > { %1048 = vset.pattern.permute.xlu1 %v1135_v5 }
  0x8a   : > { %416 = vperm.xlu1 %1048, %v1269_v11  }
  0x8e   : > { %1049 = vset.pattern.permute.xlu1 %v1134_v2  ;;  %v285_v19 = vpop.permute.xlu1 %284  ;;  %v186_v20 = vpop.permute.xlu0 %185 }
  0x8f   : > { %255 = vperm.xlu1 %1049, %v1328_v18   ;;  %v267_v47 = vmul.f32 %v1380_v41, %v186_v20 }
  0x91   : > { %v347_v53 = vadd.f32 %v285_v19, %v267_v47 }
  0x92   : > { %v289_v21 = vpop.permute.xlu1 %288  ;;  %v191_v22 = vpop.permute.xlu0 %190 }
  0x93   : > { %1051 = vset.pattern.permute.xlu1 %v1133_v1  ;;  %v268_v43 = vmul.f32 %v1380_v41, %v191_v22 }
  0x94   : > { %340 = vperm.xlu1 %1051, %v1328_v18  }
  0x95   : > { %v348_v48 = vadd.f32 %v289_v21, %v268_v43 }
  0x96   : > { %v201_v23 = vpop.permute.xlu0 %200 }
  0x97   : > { %v369_v24 = vpop.permute.xlu1 %368  ;;  %v270_v49 = vmul.f32 %v1380_v41, %v201_v23 }
  0x98   : > { %344 = vperm.xlu1 %1051, %v1277_v12   ;;  %v432_v45 = vmul.f32 %v1382_v42, %v369_v24  ;;  %v1137_v24 = vmov 4  }
  0x99   : > { %1056 = vset.pattern.permute.xlu0 %v1137_v24 }
  0x9a   : > { %v211_v25 = vpop.permute.xlu0 %210  ;;  %v448_v51 = vadd.f32 %v432_v45, %v348_v48  ;;  %733 = vperm.xlu0 %1056, %v1220_v3  }
  0x9b   : > { %v272_v19 = vmul.f32 %v1380_v41, %v211_v25 }
  0x9c   : > { %1052 = vset.pattern.permute.xlu1 %v1135_v5  ;;  %v196_v26 = vpop.permute.xlu1 %195  ;;  %v464_v60 = vmax.f32 %v448_v51, 0.0 }
  0x9d   : > { %424 = vperm.xlu1 %1052, %v1277_v12   ;;  %v269_v57 = vmul.f32 %v1380_v41, %v196_v26 }
  0x9e   : > { %v1363_v27 = vpop.permute.xlu0 %220  ;;  %741 = vperm.xlu0 %1056, %v1227_v4  }
  0xa1   : > { %v293_v29 = vpop.permute.xlu1 %292  ;;  %1053 = vset.pattern.permute.xlu1 %v1136_v50 }
  0xa2   : > { %v1365_v30 = vpop.permute.xlu0 %230  ;;  %504 = vperm.xlu1 %1053, %v1211_v0   ;;  %v349_v61 = vadd.f32 %v293_v29, %v269_v57  ;;  %745 = vperm.xlu0 %1056, %v1282_v13  }
  0xa5   : > { %v297_v32 = vpop.permute.xlu1 %296 }
  0xa6   : > { %v1370_v33 = vpop.permute.xlu0 %240  ;;  %v350_v58 = vadd.f32 %v297_v32, %v270_v49  ;;  %512 = vperm.xlu1 %1053, %v1240_v7   ;;  %749 = vperm.xlu0 %1056, %v1235_v6  }
  0xaa   : > { %v377_v39 = vpop.permute.xlu1 %376  ;;  %v1378_v40 = vpop.permute.xlu0 %250  ;;  %516 = vperm.xlu1 %1053, %v1227_v4   ;;  %v274_v4 = vmul.f32 %v1380_v41, %v1363_v27  ;;  %753 = vperm.xlu0 %1056, %v1299_v14  }
  0xab   : > { %v434_v54 = vmul.f32 %v1382_v42, %v377_v39 }
  0xad   : > { %v450_v63 = vadd.f32 %v434_v54, %v350_v58 }
  0xae   : > { %v1385_v44 = vpop.permute.xlu0 %260  ;;  %1055 = vset.pattern.permute.xlu1 %v1137_v24  ;;  %757 = vperm.xlu0 %1056, %v1247_v8  }
  0xaf   : > { %v206_v46 = vpop.permute.xlu1 %205  ;;  %v466_v26 = vmax.f32 %v450_v63, 0.0  ;;  %729 = vperm.xlu1 %1055, %v1211_v0  }
  0xb0   : > { %v271_v20 = vmul.f32 %v1380_v41, %v206_v46 }
  0xb2   : > { %761 = vperm.xlu0 %1056, %v1307_v15  }
  0xb3   : > { %v365_v52 = vpop.permute.xlu0 %364  ;;  %737 = vperm.xlu1 %1055, %v1240_v7  }
  0xb4   : > { %v431_v55 = vmul.f32 %v1382_v42, %v365_v52  ;;  %v301_v56 = vpop.permute.xlu1 %300 }
  0xb5   : > { %v351_v28 = vadd.f32 %v301_v56, %v271_v20 }
  0xb6   : > { %v447_v59 = vadd.f32 %v431_v55, %v347_v53  ;;  %765 = vperm.xlu0 %1056, %v1254_v9  }
  0xb7   : > { %v373_v62 = vpop.permute.xlu0 %372  ;;  %1057 = vset.pattern.permute.xlu1 %v1136_v50 }
  0xb8   : > { %v463_v1 = vmax.f32 %v447_v59, 0.0  ;;  %v433_v2 = vmul.f32 %v1382_v42, %v373_v62  ;;  %v305_v5 = vpop.permute.xlu1 %304  ;;  %524 = vperm.xlu1 %1057, %v1235_v6  }
  0xb9   : > { %v352_v34 = vadd.f32 %v305_v5, %v272_v19 }
  0xba   : > { %v495_v21 = vpack.c.bf16 %v464_v60, %v463_v1  ;;  %v449_v22 = vadd.f32 %v433_v2, %v349_v61  ;;  %769 = vperm.xlu0 %1056, %v1314_v16  }
  0xbb   : > { %v381_v23 = vpop.permute.xlu0 %380 }
  0xbc   : > { %v465_v29 = vmax.f32 %v449_v22, 0.0  ;;  %v435_v31 = vmul.f32 %v1382_v42, %v381_v23  ;;  %935 = vmatprep.subr.bf16.mxu0 %v495_v21  ;;  %967 = vmatprep.subr.bf16.mxu1 %v495_v21 }
  0xbd   : > { %v385_v32 = vpop.permute.xlu1 %384  ;;  %936 = vmatpush3.bf16.msra.mxu0 %v495_v21  ;;  %975 = vmatpush3.bf16.msra.mxu1 %v495_v21 }
  0xbe   : > { %v496_v25 = vpack.c.bf16 %v466_v26, %v465_v29  ;;  %v451_v35 = vadd.f32 %v435_v31, %v351_v28  ;;  %v436_v36 = vmul.f32 %v1382_v42, %v385_v32  ;;  %528 = vperm.xlu1 %1057, %v1299_v14   ;;  %773 = vperm.xlu0 %1056, %v1262_v10   ;;  %v1138_v26 = vmov 5  }
  0xbf   : > { %v389_v3 = vpop.permute.xlu0 %388 }
  0xc0   : > { %v452_v37 = vadd.f32 %v436_v36, %v352_v34  ;;  %937 = vmatprep.subr.bf16.mxu0 %v496_v25  ;;  %968 = vmatprep.subr.bf16.mxu1 %v496_v25  ;;  %v467_v38 = vmax.f32 %v451_v35, 0.0  ;;  %v437_v51 = vmul.f32 %v1382_v42, %v389_v3 }
  0xc1   : > { %938 = vmatpush3.bf16.msra.mxu0 %v496_v25  ;;  %976 = vmatpush3.bf16.msra.mxu1 %v496_v25 }
  0xc2   : > { %v468_v39 = vmax.f32 %v452_v37, 0.0  ;;  %v216_v43 = vpop.permute.xlu1 %215  ;;  %532 = vperm.xlu1 %1057, %v1247_v8   ;;  %v276_v8 = vmul.f32 %v1380_v41, %v1365_v30  ;;  %777 = vperm.xlu0 %1056, %v1321_v17  }
  0xc3   : > { %v273_v47 = vmul.f32 %v1380_v41, %v216_v43  ;;  %v397_v14 = vpop.permute.xlu0 %396 }
  0xc4   : > { %v497_v45 = vpack.c.bf16 %v468_v39, %v467_v38  ;;  %v439_v60 = vmul.f32 %v1382_v42, %v397_v14 }
  0xc6   : > { %939 = vmatprep.subr.bf16.mxu0 %v497_v45  ;;  %969 = vmatprep.subr.bf16.mxu1 %v497_v45 }
  0xc7   : > { %v309_v46 = vpop.permute.xlu1 %308  ;;  %940 = vmatpush3.bf16.msra.mxu0 %v497_v45  ;;  %977 = vmatpush3.bf16.msra.mxu1 %v497_v45  ;;  %v405_v19 = vpop.permute.xlu0 %404 }
  0xc8   : > { %v353_v49 = vadd.f32 %v309_v46, %v273_v47  ;;  %536 = vperm.xlu1 %1057, %v1307_v15   ;;  %781 = vperm.xlu0 %1056, %v1269_v11   ;;  %v441_v22 = vmul.f32 %v1382_v42, %v405_v19 }
  0xca   : > { %v453_v7 = vadd.f32 %v437_v51, %v353_v49 }
  0xcb   : > { %v313_v48 = vpop.permute.xlu1 %312  ;;  %v413_v37 = vpop.permute.xlu0 %412 }
  0xcc   : > { %v354_v13 = vadd.f32 %v313_v48, %v274_v4  ;;  %v469_v54 = vmax.f32 %v453_v7, 0.0  ;;  %540 = vperm.xlu1 %1057, %v1254_v9   ;;  %789 = vperm.xlu0 %1056, %v1277_v12   ;;  %v443_v38 = vmul.f32 %v1382_v42, %v413_v37 }
  0xcf   : > { %v421_v7 = vpop.permute.xlu0 %420 }
  0xd0   : > { %v393_v52 = vpop.permute.xlu1 %392  ;;  %544 = vperm.xlu1 %1057, %v1314_v16   ;;  %1060 = vset.pattern.permute.xlu0 %v1138_v26 }
  0xd1   : > { %v438_v53 = vmul.f32 %v1382_v42, %v393_v52 }
  0xd3   : > { %v454_v50 = vadd.f32 %v438_v53, %v354_v13  ;;  %v282_v13 = vmul.f32 %v1380_v41, %v1385_v44  ;;  %v445_v53 = vmul.f32 %v1382_v42, %v421_v7  ;;  %v1066_v44 = vld [vmem:[%s1532_s2 + $0x30] sm:$0xff]  }
  0xd4   : > { %548 = vperm.xlu1 %1057, %v1262_v10  }
  0xd5   : > { %v470_v55 = vmax.f32 %v454_v50, 0.0  ;;  %v226_v27 = vpop.permute.xlu1 %225 }
  0xd6   : > { %v275_v57 = vmul.f32 %v1380_v41, %v226_v27 }
  0xd7   : > { %v498_v56 = vpack.c.bf16 %v470_v55, %v469_v54 }
  0xd8   : > { %552 = vperm.xlu1 %1057, %v1321_v17   ;;  %v278_v17 = vmul.f32 %v1380_v41, %v1370_v33 }
  0xd9   : > { %941 = vmatprep.subr.bf16.mxu0 %v498_v56  ;;  %970 = vmatprep.subr.bf16.mxu1 %v498_v56 }
  0xda   : > { %v317_v6 = vpop.permute.xlu1 %316  ;;  %942 = vmatpush3.bf16.msra.mxu0 %v498_v56  ;;  %978 = vmatpush3.bf16.msra.mxu1 %v498_v56 }
  0xdb   : > { %v355_v59 = vadd.f32 %v317_v6, %v275_v57 }
  0xdc   : > { %556 = vperm.xlu1 %1057, %v1269_v11  }
  0xdd   : > { %v455_v15 = vadd.f32 %v439_v60, %v355_v59  ;;  %v1068_v59 = vld [vmem:[%s1532_s2 + $0x38] sm:$0xff]  }
  0xde   : > { %v321_v58 = vpop.permute.xlu1 %320 }
  0xdf   : > { %v356_v62 = vadd.f32 %v321_v58, %v276_v8  ;;  %v471_v9 = vmax.f32 %v455_v15, 0.0  ;;  %v1063_v58 = vld [vmem:[%s1532_s2 + $0x8] sm:$0xff]   ;;  %v1067_v8 = vld [vmem:[%s1532_s2 + $0x18] sm:$0xff]   ;;  %v509_v15 = vpop.permute.xlu0 %508 }
  0xe0   : > { %560 = vperm.xlu1 %1057, %v1328_v18  }
  0xe3   : > { %v401_v61 = vpop.permute.xlu1 %400 }
  0xe4   : > { %v440_v63 = vmul.f32 %v1382_v42, %v401_v61  ;;  %564 = vperm.xlu1 %1057, %v1277_v12  }
  0xe6   : > { %v456_v1 = vadd.f32 %v440_v63, %v356_v62  ;;  %v521_v63 = vpop.permute.xlu0 %520 }
  0xe8   : > { %v472_v2 = vmax.f32 %v456_v1, 0.0  ;;  %v236_v30 = vpop.permute.xlu1 %235  ;;  %1058 = vset.pattern.permute.xlu1 %v1137_v24  ;;  %v280_v24 = vmul.f32 %v1380_v41, %v1378_v40 }
  0xe9   : > { %v277_v10 = vmul.f32 %v1380_v41, %v236_v30  ;;  %785 = vperm.xlu1 %1058, %v1328_v18  }
  0xea   : > { %v499_v5 = vpack.c.bf16 %v472_v2, %v471_v9 }
  0xec   : > { %943 = vmatprep.subr.bf16.mxu0 %v499_v5  ;;  %971 = vmatprep.subr.bf16.mxu1 %v499_v5 }
  0xed   : > { %v325_v16 = vpop.permute.xlu1 %324  ;;  %944 = vmatpush3.bf16.msra.mxu0 %v499_v5  ;;  %979 = vmatpush3.bf16.msra.mxu1 %v499_v5 }
  0xee   : > { %v357_v21 = vadd.f32 %v325_v16, %v277_v10  ;;  %1059 = vset.pattern.permute.xlu1 %v1138_v26 }
  0xef   : > { %830 = vperm.xlu1 %1059, %v1211_v0  }
  0xf0   : > { %v457_v28 = vadd.f32 %v441_v22, %v357_v21 }
  0xf1   : > { %v329_v20 = vpop.permute.xlu1 %328 }
  0xf2   : > { %v358_v29 = vadd.f32 %v329_v20, %v278_v17  ;;  %v473_v32 = vmax.f32 %v457_v28, 0.0 }
  0xf6   : > { %v409_v23 = vpop.permute.xlu1 %408 }
  0xf7   : > { %v442_v11 = vmul.f32 %v1382_v42, %v409_v23 }
  0xf9   : > { %v458_v31 = vadd.f32 %v442_v11, %v358_v29 }
  0xfb   : > { %v474_v25 = vmax.f32 %v458_v31, 0.0  ;;  %v246_v34 = vpop.permute.xlu1 %245 }
  0xfc   : > { %v279_v36 = vmul.f32 %v1380_v41, %v246_v34 }
  0xfd   : > { %v500_v35 = vpack.c.bf16 %v474_v25, %v473_v32 }
  0xff   : > { %945 = vmatprep.subr.bf16.mxu0 %v500_v35  ;;  %972 = vmatprep.subr.bf16.mxu1 %v500_v35 }
 0x100   : > { %v333_v33 = vpop.permute.xlu1 %332  ;;  %946 = vmatpush3.bf16.msra.mxu0 %v500_v35  ;;  %980 = vmatpush3.bf16.msra.mxu1 %v500_v35 }
 0x101   : > { %v359_v39 = vadd.f32 %v333_v33, %v279_v36 }
 0x103   : > { %v459_v43 = vadd.f32 %v443_v38, %v359_v39 }
 0x104   : > { %v337_v12 = vpop.permute.xlu1 %336 }
 0x105   : > { %v360_v45 = vadd.f32 %v337_v12, %v280_v24  ;;  %v475_v47 = vmax.f32 %v459_v43, 0.0 }
 0x109   : > { %v417_v18 = vpop.permute.xlu1 %416 }
 0x10a   : > { %v444_v46 = vmul.f32 %v1382_v42, %v417_v18 }
 0x10c   : > { %v460_v3 = vadd.f32 %v444_v46, %v360_v45 }
 0x10e   : > { %v476_v48 = vmax.f32 %v460_v3, 0.0  ;;  %v256_v4 = vpop.permute.xlu1 %255 }
 0x10f   : > { %v281_v51 = vmul.f32 %v1380_v41, %v256_v4  ;;  %v1064_v41 = vld [vmem:[%s1532_s2 + $0x28] sm:$0xff]  }
 0x110   : > { %v501_v0 = vpack.c.bf16 %v476_v48, %v475_v47 }
 0x112   : > { %947 = vmatprep.subr.bf16.mxu0 %v501_v0  ;;  %973 = vmatprep.subr.bf16.mxu1 %v501_v0 }
 0x113   : > { %v341_v49 = vpop.permute.xlu1 %340  ;;  %948 = vmatpush3.bf16.msra.mxu0 %v501_v0  ;;  %981 = vmatpush3.bf16.msra.mxu1 %v501_v0 }
 0x114   : > { %v361_v40 = vadd.f32 %v341_v49, %v281_v51 }
 0x116   : > { %v461_v54 = vadd.f32 %v445_v53, %v361_v40 }
 0x117   : > { %v345_v52 = vpop.permute.xlu1 %344 }
 0x118   : > { %v362_v55 = vadd.f32 %v345_v52, %v282_v13  ;;  %v477_v6 = vmax.f32 %v461_v54, 0.0 }
 0x119   : > { %v734_v9 = vpop.permute.xlu0 %733 }
 0x11c   : > { %v425_v50 = vpop.permute.xlu1 %424 }
 0x11d   : > { %v446_v27 = vmul.f32 %v1382_v42, %v425_v50  ;;  %v1065_v42 = vld [vmem:[%s1532_s2 + $0x10] sm:$0xff]   ;;  %v742_v30 = vpop.permute.xlu0 %741 }
 0x11f   : > { %v462_v56 = vadd.f32 %v446_v27, %v362_v55 }
 0x121   : > { %v478_v14 = vmax.f32 %v462_v56, 0.0  ;;  %v505_v60 = vpop.permute.xlu1 %504  ;;  %v746_v16 = vpop.permute.xlu0 %745 }
 0x123   : > { %v502_v57 = vpack.c.bf16 %v478_v14, %v477_v6 }
 0x125   : > { %949 = vmatprep.subr.bf16.mxu0 %v502_v57  ;;  %974 = vmatprep.subr.bf16.mxu1 %v502_v57  ;;  %v513_v61 = vpop.permute.xlu1 %512  ;;  %v750_v10 = vpop.permute.xlu0 %749 }
 0x126   : > { %950 = vmatpush3.bf16.msra.mxu0 %v502_v57  ;;  %982 = vmatpush3.bf16.msra.mxu1 %v502_v57 }
 0x129   : > { %952 = vmatmul.mubr.bf16.vlgmr.msra.gmra.mrb[0].mxu0 %v1063_v58  ;;  %960 = vmatmul.mubr.bf16.vlgmr.msra.gmra.mrb[0].mxu1 %v1064_v41  ;;  %v517_v62 = vpop.permute.xlu1 %516  ;;  %v754_v21 = vpop.permute.xlu0 %753 }
 0x12a   : > { %955 = vmatprep.mubr.bf16.mxu0 %v1065_v42  ;;  %963 = vmatprep.mubr.bf16.mxu1 %v1066_v44 }
 0x12d   : > { %v758_v17 = vpop.permute.xlu0 %757 }
 0x12e   : > { %v730_v1 = vpop.permute.xlu1 %729 }
 0x131   : > { %956 = vmatmul.mubr.bf16.gmra.mrb[4].mxu0 %v1067_v8  ;;  %964 = vmatmul.mubr.bf16.gmra.mrb[4].mxu1 %v1068_v59  ;;  %v762_v26 = vpop.permute.xlu0 %761 }
 0x132   : > { %v738_v2 = vpop.permute.xlu1 %737 }
 0x135   : > { %v1480_v29 = vpop.permute.xlu0 %765 }
 0x137   : > { %v525_v5 = vpop.permute.xlu1 %524 }
 0x139   : > { %v770_v46 = vpop.permute.xlu0 %769 }
 0x13d   : > { %v529_v19 = vpop.permute.xlu1 %528 }
 0x141   : > { %v533_v20 = vpop.permute.xlu1 %532 }
 0x147   : > { %v537_v22 = vpop.permute.xlu1 %536 }
 0x14b   : > { %v541_v23 = vpop.permute.xlu1 %540 }
 0x14f   : > { %v545_v28 = vpop.permute.xlu1 %544 }
 0x153   : > { %v549_v11 = vpop.permute.xlu1 %548 }
 0x157   : > { %v553_v3 = vpop.permute.xlu1 %552 }
 0x1fc   : > { %v953_v31 = vpop.f32.mrb[0].mxu0  ;;  %v961_v32 = vpop.f32.mrb[0].mxu1 }
 0x1fd   : > { %v649_v25 = vpop.f32.mrb[1].mxu0  ;;  %v681_v34 = vpop.f32.mrb[1].mxu1  ;;  %v658_v35 = vadd.f32 %v953_v31, %v513_v61 }
 0x1fe   : > { %v650_v33 = vadd.f32 %v649_v25, %v505_v60  ;;  %v954_v36 = vpop.f32.mrb[2].mxu0  ;;  %v962_v12 = vpop.f32.mrb[2].mxu1  ;;  %v682_v41 = vadd.f32 %v681_v34, %v537_v22 }
 0x1ff   : > { %v661_v37 = vadd.f32 %v954_v36, %v517_v62  ;;  %v652_v38 = vpop.f32.mrb[3].mxu0  ;;  %v684_v39 = vpop.f32.mrb[3].mxu1  ;;  %v714_v43 = vmax.f32 %v658_v35, 0.0  ;;  %v693_v31 = vadd.f32 %v962_v12, %v549_v11 }
 0x200   : > { %v712_v24 = vmax.f32 %v650_v33, 0.0  ;;  %v653_v18 = vadd.f32 %v652_v38, %v509_v15  ;;  %v557_v60 = vpop.permute.xlu1 %556  ;;  %v685_v61 = vadd.f32 %v684_v39, %v541_v23 }
 0x201   : > { %v715_v47 = vmax.f32 %v661_v37, 0.0  ;;  %v794_v7 = vmul.f32 %v738_v2, %v714_v43  ;;  %v720_v2 = vmax.f32 %v682_v41, 0.0  ;;  %v723_v37 = vmax.f32 %v693_v31, 0.0 }
 0x202   : > { %v713_v45 = vmax.f32 %v653_v18, 0.0  ;;  %v792_v48 = vmul.f32 %v730_v1, %v712_v24  ;;  %v721_v25 = vmax.f32 %v685_v61, 0.0 }
 0x203   : > { %v795_v55 = vmul.f32 %v742_v30, %v715_v47  ;;  %v800_v34 = vmul.f32 %v762_v26, %v720_v2 }
 0x204   : > { %v793_v4 = vmul.f32 %v734_v9, %v713_v45  ;;  %v957_v0 = vpop.f32.mrb[4].mxu0  ;;  %v965_v49 = vpop.f32.mrb[4].mxu1  ;;  %v690_v9 = vadd.f32 %v961_v32, %v545_v28  ;;  %v801_v23 = vmul.f32 %v1480_v29, %v721_v25 }
 0x205   : > { %v665_v51 = vpop.f32.mrb[5].mxu0  ;;  %v697_v52 = vpop.f32.mrb[5].mxu1  ;;  %v674_v13 = vadd.f32 %v957_v0, %v529_v19 }
 0x206   : > { %v808_v40 = vadd.f32 %v793_v4, %v792_v48  ;;  %v666_v53 = vadd.f32 %v665_v51, %v521_v63  ;;  %v958_v50 = vpop.f32.mrb[6].mxu0  ;;  %v966_v54 = vpop.f32.mrb[6].mxu1  ;;  %v722_v22 = vmax.f32 %v690_v9, 0.0 }
 0x207   : > { %v668_v27 = vpop.f32.mrb[7].mxu0  ;;  %v700_v56 = vpop.f32.mrb[7].mxu1  ;;  %v677_v57 = vadd.f32 %v958_v50, %v533_v20  ;;  %v718_v42 = vmax.f32 %v674_v13, 0.0 }
 0x208   : > { %v809_v6 = vadd.f32 %v808_v40, %v794_v7  ;;  %v716_v14 = vmax.f32 %v666_v53, 0.0  ;;  %v669_v58 = vadd.f32 %v668_v27, %v525_v5  ;;  %v774_v63 = vpop.permute.xlu0 %773  ;;  %v561_v5 = vpop.permute.xlu1 %560  ;;  %v802_v39 = vmul.f32 %v770_v46, %v722_v22 }
 0x209   : > { %v719_v62 = vmax.f32 %v677_v57, 0.0  ;;  %v798_v30 = vmul.f32 %v754_v21, %v718_v42  ;;  %v706_v28 = vadd.f32 %v965_v49, %v561_v5  ;;  %v803_v11 = vmul.f32 %v774_v63, %v723_v37 }
 0x20a   : > { %v796_v44 = vmul.f32 %v746_v16, %v716_v14  ;;  %v810_v8 = vadd.f32 %v809_v6, %v795_v55  ;;  %v717_v59 = vmax.f32 %v669_v58, 0.0  ;;  %v698_v16 = vadd.f32 %v697_v52, %v553_v3 }
 0x20b   : > { %v799_v35 = vmul.f32 %v758_v17, %v719_v62  ;;  %v726_v26 = vmax.f32 %v706_v28, 0.0 }
 0x20c   : > { %v811_v15 = vadd.f32 %v810_v8, %v796_v44  ;;  %v797_v1 = vmul.f32 %v750_v10, %v717_v59  ;;  %v778_v36 = vpop.permute.xlu0 %777  ;;  %v701_v10 = vadd.f32 %v700_v56, %v557_v60  ;;  %v724_v32 = vmax.f32 %v698_v16, 0.0  ;;  %v565_v24 = vpop.permute.xlu1 %564 }
 0x20d   : > { %v709_v12 = vadd.f32 %v966_v54, %v565_v24 }
 0x20e   : > { %v812_v19 = vadd.f32 %v811_v15, %v797_v1  ;;  %v725_v17 = vmax.f32 %v701_v10, 0.0  ;;  %v804_v45 = vmul.f32 %v778_v36, %v724_v32 }
 0x20f   : > { %v727_v48 = vmax.f32 %v709_v12, 0.0 }
 0x210   : > { %v813_v20 = vadd.f32 %v812_v19, %v798_v30  ;;  %v782_v43 = vpop.permute.xlu0 %781  ;;  %v786_v47 = vpop.permute.xlu1 %785 }
 0x211   : > { %v805_v29 = vmul.f32 %v782_v43, %v725_v17  ;;  %v806_v0 = vmul.f32 %v786_v47, %v726_v26 }
 0x212   : > { %v814_v33 = vadd.f32 %v813_v20, %v799_v35 }
 0x214   : > { %v815_v38 = vadd.f32 %v814_v33, %v800_v34  ;;  %v790_v49 = vpop.permute.xlu0 %789  ;;  %v831_v55 = vpop.permute.xlu1 %830 }
 0x215   : > { %v807_v51 = vmul.f32 %v790_v49, %v727_v48 }
 0x216   : > { %v816_v21 = vadd.f32 %v815_v38, %v801_v23 }
 0x218   : > { %v817_v18 = vadd.f32 %v816_v21, %v802_v39 }
 0x21a   : > { %v818_v3 = vadd.f32 %v817_v18, %v803_v11 }
 0x21c   : > { %v819_v4 = vadd.f32 %v818_v3, %v804_v45 }
 0x21e   : > { %v820_v46 = vadd.f32 %v819_v4, %v805_v29 }
 0x220   : > { %v821_v52 = vadd.f32 %v820_v46, %v806_v0 }
 0x222   : > { %v822_v7 = vadd.f32 %v821_v52, %v807_v51 }
 0x224   : > { %v823_v40 = vrot.slane %v822_v7, 4 }
 0x226   : > { %v824_v13 = vadd.f32 %v823_v40, %v822_v7 }
 0x228   : > { %v825_v53 = vrot.slane %v824_v13, 2 }
 0x22a   : > { %v826_v50 = vadd.f32 %v825_v53, %v824_v13 }
 0x22c   : > { %v827_v54 = vrot.slane %v826_v50, 1 }
 0x22e   : > { %v828_v27 = vadd.f32 %v827_v54, %v826_v50 }
 0x230   : > { %v833_v56 = vadd.f32 %v831_v55, %v828_v27 }
 0x232   : > { %834 = vst [vmem:[%s160_s25] sm:$0x1] %v833_v56 }
 0x233   : > { %1082 = shalt.err (!%p1079_p3)
}
 0x234   : > { %s1083_s7 = scalar_lea.hbm %s1488_s29, 16  ;;  %s1087_s10 = scalar_lea.hbm %s1533_s3, 32 }
 0x235   : > { %p1084_p4 = scmp.ne.s32.totalorder %s1488_s29, %s1083_s7  ;;  %p1088_p9 = scmp.lt.u32.totalorder %s1488_s29, %s1533_s3 }
 0x236   : > { %p1089_p10 = scmp.lt.u32.totalorder %s1087_s10, %s1083_s7  ;;  %p1091_p12 = scmp.lt.u32.totalorder %s1083_s7, %s1488_s29 }
 0x237   : > { %p1085_p7 = pnand %p1084_p4, %p1198_p5 }
 0x238   : > { %p1090_p11 = por %p1089_p10, %p1088_p9 }
 0x239   : > { %p1086_p8 = pneg %p1085_p7 }
 0x23a   : > { %p1092_p13 = por %p1091_p12, %p1090_p11 }
 0x23c   : > { %p1093_p0 = pnand %p1092_p13, %p1086_p8 }
 0x23e   : > { %1096 = shalt.err (!%p1093_p0)
}
 0x23f   : > { %983 = dma.vmem_to_hbm [thread:$0]  (%p1198_p5), %s1490_s26, 16, %s1488_s29, %s836_s30  }
 0x240 PF: > { %p989_p1 = scmp.ge.s32.totalorder %s1131_s15, 2  ;;  %s860_s19 = sand.u32 1, %s1119_s12  }
 0x241   : > { %s861_s20 = scalar_lea.sflag [#allocation3], %s860_s19 }
 0x242   : > { %p986_p2 = pnand %p989_p1, %p1202_p6 }
 0x244   : > { %1114 = dma.done.wait (!%p986_p2), %s861_s20, 16  }
 0x245   : > { %1116 = vsyncadd (!%p986_p2), %s861_s20, 4294967280  ;;  %p13_p3 = scmp.ge.s32.totalorder %s1185_s18, 4   ;;  %s1536_s12 = smov %s1123_s13 }
 0x246   : > { %s1537_s13 = smov %s1127_s14  ;;  %s1538_s14 = smov %s1196_s21 }
 0x247   : > { %s1539_s15 = smov %s1185_s18  ;;  %15 = sbr.rel (!%p13_p3) target bundleno = 3 (0x3), region = 67 }
 0x24e   :  { %865 = vsyncpa [#allocation3], 1 }
 0x24f   :  { %867 = vsyncpa [#allocation3 + $0x1], 1 }

</bundles_post_ra>
